<compile_context>
chip_gen: v7x
topology: tpu7x:2x2x1
jax: 0.10.0
libtpu: 0.0.40
codegen_flags: <defaults>
</compile_context>

<pallas_src>
import functools
import math

import jax
import jax.numpy as jnp
import numpy as np
from jax.experimental import pallas as pl
from jax.experimental.pallas import tpu as pltpu

_LANE = 128
_SUBLANE = 8
_NEG_BIG = -1e30
_SQRT_2_OVER_PI = math.sqrt(2.0 / math.pi)


def _tpu_defaults():
    """Generation-dependent VMEM limit / tile targets (bigger on v5e/v6e, tighter on v7x)."""
    vmem_phys = None
    try:
        vmem_phys = getattr(pltpu.get_tpu_info(), "vmem_capacity_bytes", None)
    except Exception:
        vmem_phys = None
    if vmem_phys is None:
        vmem_phys = 64 * 1024 * 1024                       # conservative (v7x-sized)
    if vmem_phys >= 100 * 1024 * 1024:                     # v5e / v6e: 128 MiB physical
        return {"vmem_limit": 96 * 1024 * 1024, "row_tile": 512,
                "conv_c_tile": 512, "hidden_tile": 512}
    return {"vmem_limit": 40 * 1024 * 1024, "row_tile": 256,   # v7x: 64 MiB physical
            "conv_c_tile": 256, "hidden_tile": 512}


_CFG = _tpu_defaults()


# ----------------------------------------------------------------------------
# helpers
# ----------------------------------------------------------------------------
def _round_up(x, m):
    return (x + m - 1) // m * m


def _lane_tile(n, target):
    """Largest multiple of 128 that divides n and is <= target (else the full dim)."""
    if n <= target:
        return n
    t = (target // _LANE) * _LANE
    while t >= _LANE:
        if n % t == 0:
            return t
        t -= _LANE
    return n


def _time_tile(t, target):
    """Row/time tile (multiple of 8) and the padded length it evenly tiles."""
    tile = min(target, _round_up(t, _SUBLANE))
    t_pad = _round_up(t, tile)
    return tile, t_pad


def _gelu(x):
    # tanh-approximate GELU.
    # TODO(synk): torch F.gelu default is the exact erf form; the tanh approximation
    #             (<~1e-3 abs deviation) is used because erf has no guaranteed Mosaic
    #             lowering.
    return 0.5 * x * (1.0 + jnp.tanh(_SQRT_2_OVER_PI * (x + 0.044715 * x * x * x)))


def _layernorm(x, gamma, beta, eps=1e-5):
    mu = jnp.mean(x, axis=-1, keepdims=True)
    var = jnp.mean(jnp.square(x - mu), axis=-1, keepdims=True)
    return (x - mu) * jax.lax.rsqrt(var + eps) * gamma + beta


def _compiler_params(dimension_semantics):
    return pltpu.CompilerParams(dimension_semantics=dimension_semantics,
                                vmem_limit_bytes=_CFG["vmem_limit"])


# ----------------------------------------------------------------------------
# Pallas kernels
# ----------------------------------------------------------------------------
def conv1_gelu_kernel(x_ref, w_ref, b_ref, o_ref):
    # x_ref: (1, T+2, Cin) f32 (time already zero-padded by 1 each side)
    # w_ref: (K, Cin, tC) bf16   b_ref: (1, tC) f32   o_ref: (1, T, tC) bf16
    t_out = o_ref.shape[1]
    c_out = o_ref.shape[2]
    acc = jnp.zeros((t_out, c_out), jnp.float32)
    for k in range(w_ref.shape[0]):            # unrolled over the 3 taps (unit stride)
        xk = x_ref[0, pl.ds(k, t_out), :].astype(jnp.bfloat16)
        acc = acc + jnp.dot(xk, w_ref[k], preferred_element_type=jnp.float32)
    o_ref[0] = _gelu(acc + b_ref[...]).astype(o_ref.dtype)


def conv2_gelu_pos_kernel(xe_ref, xo_ref, w_ref, b_ref, pos_ref, o_ref):
    # Stride-2 conv done with two contiguous even/odd phase inputs (no strided loads).
    # xe_ref: (1, Tp+1, Cin) bf16   xo_ref: (1, Tp, Cin) bf16
    # w_ref : (3, Cin, tC) bf16     b_ref: (1, tC) f32
    # pos_ref: (Tp, tC) f32         o_ref: (1, Tp, tC) f32
    t_out = o_ref.shape[1]
    x0 = xe_ref[0, pl.ds(0, t_out), :]         # padded index 2t
    x1 = xo_ref[0, pl.ds(0, t_out), :]         # padded index 2t + 1
    x2 = xe_ref[0, pl.ds(1, t_out), :]         # padded index 2t + 2
    acc = jnp.dot(x0, w_ref[0], preferred_element_type=jnp.float32)
    acc = acc + jnp.dot(x1, w_ref[1], preferred_element_type=jnp.float32)
    acc = acc + jnp.dot(x2, w_ref[2], preferred_element_type=jnp.float32)
    o_ref[0] = (_gelu(acc + b_ref[...]) + pos_ref[...]).astype(o_ref.dtype)


def ln_qkv_kernel(x_ref, g_ref, b_ref, wqkv_ref, bqkv_ref, qkv_ref):
    # x_ref: (1, tR, D) f32; wqkv: (D, 3D) bf16 with dh**-0.25 folded into the q/k
    # columns; single fused matmul, lane-dense (tR, 3D) bf16 output.
    xn = _layernorm(x_ref[0], g_ref[...], b_ref[...]).astype(jnp.bfloat16)
    qkv = jnp.dot(xn, wqkv_ref[...], preferred_element_type=jnp.float32) + bqkv_ref[...]
    qkv_ref[0] = qkv.astype(qkv_ref.dtype)


def attention_kernel(q_ref, k_ref, v_ref, xres_ref, wo_ref, bo_ref, o_ref,
                     m_scr, l_scr, acc_scr, *, n_head, tile_k, t_valid, masked):
    # Flash-style attention over a KV grid axis (online softmax), fused with the
    # output projection + residual add at the last KV step.
    # q_ref/k_ref/v_ref: (1, tQ/tK, D) bf16 (slices of the fused qkv array)
    # xres_ref: (1, tQ, D) f32; wo_ref: (D, D) bf16; bo_ref: (1, D) f32
    # scratch: m_scr/l_scr (tQ, H) f32, acc_scr (tQ, D) f32
    ki = pl.program_id(2)
    nk = pl.num_programs(2)

    @pl.when(ki == 0)
    def _():
        m_scr[...] = jnp.full(m_scr.shape, _NEG_BIG, m_scr.dtype)
        l_scr[...] = jnp.zeros(l_scr.shape, l_scr.dtype)
        acc_scr[...] = jnp.zeros(acc_scr.shape, acc_scr.dtype)

    q = q_ref[0]                               # (tQ, D) bf16
    k = k_ref[0]                               # (tK, D) bf16
    v = v_ref[0]                               # (tK, D) bf16
    d = q.shape[1]
    dh = d // n_head

    if masked:
        key_idx = ki * tile_k + jax.lax.broadcasted_iota(jnp.int32, (1, tile_k), 1)
        kmask = key_idx < t_valid              # (1, tK) — only padded keys are invalid

    for h in range(n_head):                    # per-head 2-D matmuls on lane slices
        sl = slice(h * dh, (h + 1) * dh)
        s = jax.lax.dot_general(q[:, sl], k[:, sl], (((1,), (1,)), ((), ())),
                                preferred_element_type=jnp.float32)   # (tQ, tK)
        if masked:
            s = jnp.where(kmask, s, _NEG_BIG)
        m_prev = m_scr[:, h:h + 1]                                     # (tQ, 1)
        m_new = jnp.maximum(m_prev, jnp.max(s, axis=-1, keepdims=True))
        alpha = jnp.exp(m_prev - m_new)
        p = jnp.exp(s - m_new)
        l_scr[:, h:h + 1] = alpha * l_scr[:, h:h + 1] + jnp.sum(p, axis=-1, keepdims=True)
        acc_scr[:, sl] = alpha * acc_scr[:, sl] + jnp.dot(
            p.astype(jnp.bfloat16), v[:, sl], preferred_element_type=jnp.float32)
        m_scr[:, h:h + 1] = m_new

    @pl.when(ki == nk - 1)
    def _():
        inv_l = 1.0 / l_scr[...]                                       # (tQ, H)
        for h in range(n_head):
            sl = slice(h * dh, (h + 1) * dh)
            acc_scr[:, sl] = acc_scr[:, sl] * inv_l[:, h:h + 1]
        ctx = acc_scr[...].astype(jnp.bfloat16)                        # (tQ, D)
        attn = jnp.dot(ctx, wo_ref[...], preferred_element_type=jnp.float32) + bo_ref[...]
        o_ref[0] = (xres_ref[0] + attn).astype(o_ref.dtype)


def mlp_kernel(x_ref, g_ref, b_ref, w1_ref, b1_ref, w2_ref, b2_ref,
               lnp_g_ref, lnp_b_ref, o_ref, acc_ref, xn_ref, *, final_ln):
    # K-tiled MLP: grid axis j streams w1 columns / w2 rows of width tH; f32 accumulator
    # in scratch; LN2 computed once (j==0) into bf16 scratch; residual + b2 (+ optional
    # fused ln_post) at the last step.
    j = pl.program_id(1)
    nj = pl.num_programs(1)

    @pl.when(j == 0)
    def _():
        xn_ref[...] = _layernorm(x_ref[...], g_ref[...], b_ref[...]).astype(xn_ref.dtype)
        acc_ref[...] = jnp.zeros(acc_ref.shape, acc_ref.dtype)

    h = jnp.dot(xn_ref[...], w1_ref[...], preferred_element_type=jnp.float32) + b1_ref[...]
    h = _gelu(h).astype(jnp.bfloat16)
    acc_ref[...] += jnp.dot(h, w2_ref[...], preferred_element_type=jnp.float32)

    @pl.when(j == nj - 1)
    def _():
        y = x_ref[...] + acc_ref[...] + b2_ref[...]
        if final_ln:                           # ln_post fused into the last block
            y = _layernorm(y, lnp_g_ref[...], lnp_b_ref[...])
        o_ref[...] = y.astype(o_ref.dtype)


# ----------------------------------------------------------------------------
# JAX wrappers (grids / BlockSpecs / parameter plumbing)
# ----------------------------------------------------------------------------
def conv1_gelu(x_btc, w_kcd, bias_1c):
    B, T, c_in = x_btc.shape
    K, c_in_w, c_out = w_kcd.shape
    assert c_in == c_in_w
    x_pad = jnp.pad(x_btc, ((0, 0), (1, 1), (0, 0)))
    tC = _lane_tile(c_out, _CFG["conv_c_tile"])
    return pl.pallas_call(
        conv1_gelu_kernel,
        grid=(B, c_out // tC),
        in_specs=[
            pl.BlockSpec((1, T + 2, c_in), lambda b, c: (b, 0, 0)),
            pl.BlockSpec((K, c_in, tC), lambda b, c: (0, 0, c)),
            pl.BlockSpec((1, tC), lambda b, c: (0, c)),
        ],
        out_specs=pl.BlockSpec((1, T, tC), lambda b, c: (b, 0, c)),
        out_shape=jax.ShapeDtypeStruct((B, T, c_out), jnp.bfloat16),
        compiler_params=_compiler_params(("parallel", "parallel")),
    )(x_pad, w_kcd, bias_1c)


def conv2_gelu_pos(x_btc, w_kcd, bias_1c, pos, t_pad):
    # stride-2 conv + GELU + positional-embedding add, output already time-padded.
    B, T1, c_in = x_btc.shape
    K, c_in_w, c_out = w_kcd.shape
    assert c_in == c_in_w
    xp = jnp.pad(x_btc, ((0, 0), (1, 1), (0, 0)))          # conv zero padding
    need = 2 * t_pad + 1                                    # last padded index used
    if xp.shape[1] < need:
        xp = jnp.pad(xp, ((0, 0), (0, need - xp.shape[1]), (0, 0)))
    x_even = xp[:, 0:need:2, :]                             # (B, t_pad + 1, Cin)
    x_odd = xp[:, 1:need:2, :]                              # (B, t_pad, Cin)
    t2 = pos.shape[0]
    pos_p = pos if t_pad == t2 else jnp.pad(pos, ((0, t_pad - t2), (0, 0)))
    tC = _lane_tile(c_out, _CFG["conv_c_tile"])
    return pl.pallas_call(
        conv2_gelu_pos_kernel,
        grid=(B, c_out // tC),
        in_specs=[
            pl.BlockSpec((1, t_pad + 1, c_in), lambda b, c: (b, 0, 0)),
            pl.BlockSpec((1, t_pad, c_in), lambda b, c: (b, 0, 0)),
            pl.BlockSpec((K, c_in, tC), lambda b, c: (0, 0, c)),
            pl.BlockSpec((1, tC), lambda b, c: (0, c)),
            pl.BlockSpec((t_pad, tC), lambda b, c: (0, c)),
        ],
        out_specs=pl.BlockSpec((1, t_pad, tC), lambda b, c: (b, 0, c)),
        out_shape=jax.ShapeDtypeStruct((B, t_pad, c_out), jnp.float32),
        compiler_params=_compiler_params(("parallel", "parallel")),
    )(x_even, x_odd, w_kcd, bias_1c, pos_p)


def ln_qkv(x_btd, blk, tile):
    B, Tp, D = x_btd.shape
    full = lambda shape: pl.BlockSpec(shape, lambda b, i: (0, 0))
    return pl.pallas_call(
        ln_qkv_kernel,
        grid=(B, Tp // tile),
        in_specs=[pl.BlockSpec((1, tile, D), lambda b, i: (b, i, 0)),
                  full((1, D)), full((1, D)),
                  full((D, 3 * D)), full((1, 3 * D))],
        out_specs=pl.BlockSpec((1, tile, 3 * D), lambda b, i: (b, i, 0)),
        out_shape=jax.ShapeDtypeStruct((B, Tp, 3 * D), jnp.bfloat16),
        compiler_params=_compiler_params(("parallel", "parallel")),
    )(x_btd, blk["ln1_g"], blk["ln1_b"], blk["wqkv"], blk["bqkv"])


def attention(qkv, x_res, blk, n_head, tile, t_valid):
    B, Tp, D3 = qkv.shape
    D = D3 // 3
    nq = Tp // tile
    nk = Tp // tile
    kern = functools.partial(attention_kernel, n_head=n_head, tile_k=tile,
                             t_valid=t_valid, masked=(Tp != t_valid))
    q_spec = pl.BlockSpec((1, tile, D), lambda b, qi, ki: (b, qi, 0))
    k_spec = pl.BlockSpec((1, tile, D), lambda b, qi, ki: (b, ki, 1))
    v_spec = pl.BlockSpec((1, tile, D), lambda b, qi, ki: (b, ki, 2))
    x_spec = pl.BlockSpec((1, tile, D), lambda b, qi, ki: (b, qi, 0))
    return pl.pallas_call(
        kern,
        grid=(B, nq, nk),
        in_specs=[q_spec, k_spec, v_spec, x_spec,
                  pl.BlockSpec((D, D), lambda b, qi, ki: (0, 0)),
                  pl.BlockSpec((1, D), lambda b, qi, ki: (0, 0))],
        out_specs=pl.BlockSpec((1, tile, D), lambda b, qi, ki: (b, qi, 0)),
        out_shape=jax.ShapeDtypeStruct((B, Tp, D), jnp.float32),
        scratch_shapes=[pltpu.VMEM((tile, n_head), jnp.float32),
                        pltpu.VMEM((tile, n_head), jnp.float32),
                        pltpu.VMEM((tile, D), jnp.float32)],
        compiler_params=_compiler_params(("parallel", "parallel", "arbitrary")),
    )(qkv, qkv, qkv, x_res, blk["wo"], blk["bo"])


def mlp(x_rows, blk, lnp_g, lnp_b, tile, final_ln):
    R, D = x_rows.shape
    Dh = blk["w1"].shape[1]
    tH = _lane_tile(Dh, _CFG["hidden_tile"])
    row_spec = pl.BlockSpec((tile, D), lambda i, j: (i, 0))
    full = lambda shape: pl.BlockSpec(shape, lambda i, j: (0, 0))
    return pl.pallas_call(
        functools.partial(mlp_kernel, final_ln=final_ln),
        grid=(R // tile, Dh // tH),
        in_specs=[row_spec, full((1, D)), full((1, D)),
                  pl.BlockSpec((D, tH), lambda i, j: (0, j)),
                  pl.BlockSpec((1, tH), lambda i, j: (0, j)),
                  pl.BlockSpec((tH, D), lambda i, j: (j, 0)),
                  full((1, D)), full((1, D)), full((1, D))],
        out_specs=row_spec,
        out_shape=jax.ShapeDtypeStruct((R, D), jnp.float32),
        scratch_shapes=[pltpu.VMEM((tile, D), jnp.float32),
                        pltpu.VMEM((tile, D), jnp.bfloat16)],
        compiler_params=_compiler_params(("parallel", "arbitrary")),
    )(x_rows, blk["ln2_g"], blk["ln2_b"], blk["w1"], blk["b1"],
      blk["w2"], blk["b2"], lnp_g, lnp_b)


def sinusoids(length, channels, max_timescale=10000):
    assert channels % 2 == 0
    log_inc = np.log(max_timescale) / (channels // 2 - 1)
    inv = np.exp(-log_inc * np.arange(channels // 2))
    t = np.arange(length)[:, None] * inv[None, :]
    return jnp.asarray(np.concatenate([np.sin(t), np.cos(t)], axis=1), dtype=jnp.float32)


def prepare_params(raw, n_head):
    """One-time packing: (in,out) bf16 weights, fused q|k|v with scale folded in,
    lane-padded conv1 input channels, (1, C) biases."""
    bf16, f32 = jnp.bfloat16, jnp.float32
    w1c = jnp.transpose(raw["conv1_w"], (2, 1, 0))                 # (K, Cin, Cout)
    pad_mels = (-w1c.shape[1]) % _LANE
    n_state = w1c.shape[2]
    scale = float(n_state // n_head) ** -0.25
    prep = {
        "pad_mels": pad_mels,
        "conv1_w": jnp.pad(w1c, ((0, 0), (0, pad_mels), (0, 0))).astype(bf16),
        "conv1_b": raw["conv1_b"].reshape(1, -1).astype(f32),
        "conv2_w": jnp.transpose(raw["conv2_w"], (2, 1, 0)).astype(bf16),
        "conv2_b": raw["conv2_b"].reshape(1, -1).astype(f32),
        "pos_emb": raw["pos_emb"].astype(f32),
        "ln_post_g": raw["ln_post_g"].reshape(1, -1).astype(f32),
        "ln_post_b": raw["ln_post_b"].reshape(1, -1).astype(f32),
        "blocks": [],
    }
    for b in raw["blocks"]:
        wq = b["wq"].T * scale                      # fold dh**-0.25 into q and k
        wk = b["wk"].T * scale
        wv = b["wv"].T
        bq = b["bq"] * scale
        wqkv = jnp.concatenate([wq, wk, wv], axis=1).astype(bf16)      # (D, 3D)
        bqkv = jnp.concatenate([bq, jnp.zeros_like(bq), b["bv"]]).reshape(1, -1).astype(f32)
        prep["blocks"].append({
            "ln1_g": b["ln1_g"].reshape(1, -1).astype(f32),
            "ln1_b": b["ln1_b"].reshape(1, -1).astype(f32),
            "wqkv": wqkv, "bqkv": bqkv,
            "wo": b["wo"].T.astype(bf16), "bo": b["bo"].reshape(1, -1).astype(f32),
            "ln2_g": b["ln2_g"].reshape(1, -1).astype(f32),
            "ln2_b": b["ln2_b"].reshape(1, -1).astype(f32),
            "w1": b["w1"].T.astype(bf16), "b1": b["b1"].reshape(1, -1).astype(f32),
            "w2": b["w2"].T.astype(bf16), "b2": b["b2"].reshape(1, -1).astype(f32),
        })
    return prep


def audio_encoder_forward(x_bmt, prep, n_head):
    """x_bmt: (B, n_mels, T) mel spectrogram, mirroring the PyTorch input."""
    x = jnp.transpose(x_bmt, (0, 2, 1))                              # (B, T, n_mels)
    if prep["pad_mels"]:
        x = jnp.pad(x, ((0, 0), (0, 0), (0, prep["pad_mels"])))      # lane-pad mels
    x = conv1_gelu(x, prep["conv1_w"], prep["conv1_b"])              # (B, T, D) bf16
    B, T1, D = x.shape
    t2 = (T1 + 2 - 3) // 2 + 1
    assert prep["pos_emb"].shape[1] == D, "incorrect audio shape"
    assert t2 <= prep["pos_emb"].shape[0], "incorrect audio shape"
    tile, t_pad = _time_tile(t2, _CFG["row_tile"])
    # stride-2 conv + GELU + pos-emb add, emitted directly at the padded time length
    x = conv2_gelu_pos(x, prep["conv2_w"], prep["conv2_b"],
                       prep["pos_emb"][:t2], t_pad)                  # (B, t_pad, D) f32
    n_blocks = len(prep["blocks"])
    for li, blk in enumerate(prep["blocks"]):
        qkv = ln_qkv(x, blk, tile)                                   # (B, t_pad, 3D) bf16
        x = attention(qkv, x, blk, n_head, tile, t_valid=t2)         # (B, t_pad, D) f32
        x = mlp(x.reshape(B * t_pad, D), blk, prep["ln_post_g"], prep["ln_post_b"],
                tile, final_ln=(li == n_blocks - 1)).reshape(B, t_pad, D)
    return x[:, :t2, :]


# ----------------------------------------------------------------------------
# pure-JAX reference (same mixed-precision math, no Pallas)
# ----------------------------------------------------------------------------
def _ref_forward(x_bmt, prep, n_head):
    bf16, f32 = jnp.bfloat16, jnp.float32

    def ln(z, g, b):
        mu = jnp.mean(z, -1, keepdims=True)
        var = jnp.mean((z - mu) ** 2, -1, keepdims=True)
        return (z - mu) * jax.lax.rsqrt(var + 1e-5) * g + b

    def conv(z, w, b, stride):
        T = z.shape[1]
        K = w.shape[0]
        t_out = (T + 2 - K) // stride + 1
        zp = jnp.pad(z, ((0, 0), (1, 1), (0, 0)))
        acc = sum(jnp.einsum("btc,cd->btd",
                             zp[:, k:k + stride * (t_out - 1) + 1:stride, :], w[k],
                             preferred_element_type=f32) for k in range(K))
        return acc + b

    x = jnp.transpose(x_bmt, (0, 2, 1))
    if prep["pad_mels"]:
        x = jnp.pad(x, ((0, 0), (0, 0), (0, prep["pad_mels"])))
    x = _gelu(conv(x.astype(bf16), prep["conv1_w"], prep["conv1_b"], 1)).astype(bf16)
    a2 = conv(x, prep["conv2_w"], prep["conv2_b"], 2)
    t2 = a2.shape[1]
    x = _gelu(a2) + prep["pos_emb"][:t2]
    B, T, D = x.shape
    dh = D // n_head
    for blk in prep["blocks"]:
        xn = ln(x, blk["ln1_g"], blk["ln1_b"]).astype(bf16)
        qkv = jnp.einsum("btd,de->bte", xn, blk["wqkv"],
                         preferred_element_type=f32) + blk["bqkv"]
        q = qkv[..., :D].astype(bf16).reshape(B, T, n_head, dh)
        k = qkv[..., D:2 * D].astype(bf16).reshape(B, T, n_head, dh)
        v = qkv[..., 2 * D:].astype(bf16).reshape(B, T, n_head, dh)
        s = jnp.einsum("bqhc,bkhc->bhqk", q, k, preferred_element_type=f32)
        p = jax.nn.softmax(s, axis=-1)
        o = jnp.einsum("bhqk,bkhc->bqhc", p.astype(bf16), v,
                       preferred_element_type=f32).reshape(B, T, D).astype(bf16)
        x = x + jnp.einsum("btd,de->bte", o, blk["wo"],
                           preferred_element_type=f32) + blk["bo"]
        xn2 = ln(x, blk["ln2_g"], blk["ln2_b"]).astype(bf16)
        h = _gelu(jnp.einsum("btd,de->bte", xn2, blk["w1"],
                             preferred_element_type=f32) + blk["b1"]).astype(bf16)
        x = x + jnp.einsum("btd,de->bte", h, blk["w2"],
                           preferred_element_type=f32) + blk["b2"]
    return ln(x, prep["ln_post_g"], prep["ln_post_b"])


# ----------------------------------------------------------------------------
# deterministic parameter init + main
# ----------------------------------------------------------------------------
def init_params(key, n_mels, n_ctx, n_state, n_layer):
    def nrm(k, shape, s=0.02):
        return (s * jax.random.normal(k, shape)).astype(jnp.float32)

    keys = iter(jax.random.split(key, 8 + 16 * n_layer))
    params = {
        "conv1_w": nrm(next(keys), (n_state, n_mels, 3)),
        "conv1_b": nrm(next(keys), (n_state,)),
        "conv2_w": nrm(next(keys), (n_state, n_state, 3)),
        "conv2_b": nrm(next(keys), (n_state,)),
        "pos_emb": sinusoids(n_ctx, n_state),
        "ln_post_g": jnp.ones((n_state,), jnp.float32),
        "ln_post_b": jnp.zeros((n_state,), jnp.float32),
        "blocks": [],
    }
    n_mlp = 4 * n_state
    for _ in range(n_layer):
        params["blocks"].append({
            "ln1_g": jnp.ones((n_state,), jnp.float32),
            "ln1_b": jnp.zeros((n_state,), jnp.float32),
            "wq": nrm(next(keys), (n_state, n_state)),
            "bq": nrm(next(keys), (n_state,)),
            "wk": nrm(next(keys), (n_state, n_state)),
            "wv": nrm(next(keys), (n_state, n_state)),
            "bv": nrm(next(keys), (n_state,)),
            "wo": nrm(next(keys), (n_state, n_state)),
            "bo": nrm(next(keys), (n_state,)),
            "ln2_g": jnp.ones((n_state,), jnp.float32),
            "ln2_b": jnp.zeros((n_state,), jnp.float32),
            "w1": nrm(next(keys), (n_mlp, n_state)),
            "b1": nrm(next(keys), (n_mlp,)),
            "w2": nrm(next(keys), (n_state, n_mlp)),
            "b2": nrm(next(keys), (n_state,)),
        })
    return params


if __name__ == "__main__":
    B, n_mels, T_in = 2, 80, 32        # mel-spectrogram input length
    n_ctx = T_in // 2                  # after the stride-2 conv
    n_state, n_head, n_layer = 128, 4, 2

    key = jax.random.PRNGKey(0)
    k_x, k_p = jax.random.split(key)
    x = jax.random.normal(k_x, (B, n_mels, T_in), dtype=jnp.float32)
    raw_params = init_params(k_p, n_mels, n_ctx, n_state, n_layer)
    prep = prepare_params(raw_params, n_head)

    out = jax.block_until_ready(audio_encoder_forward(x, prep, n_head))
    assert out.shape == (B, n_ctx, n_state), out.shape

    ref = jax.block_until_ready(_ref_forward(x, prep, n_head))
    np.testing.assert_allclose(np.asarray(out, np.float32), np.asarray(ref, np.float32),
                               rtol=2e-2, atol=2e-2)
    print("KERNEL_OK")
</pallas_src>

<mosaic_0001>
module attributes {stable_mosaic.version = 11 : i64} {
  func.func @conv1_gelu_kernel(%arg0: i32, %arg1: i32, %arg2: memref<1x34x128xf32, #tpu.memory_space<vmem>>, %arg3: memref<3x128x128xbf16, #tpu.memory_space<vmem>>, %arg4: memref<1x128xf32, #tpu.memory_space<vmem>>, %arg5: memref<1x32x128xbf16, #tpu.memory_space<vmem>>) attributes {dimension_semantics = [#tpu.dimension_semantics<parallel>, #tpu.dimension_semantics<parallel>], iteration_bounds = array<i64: 2, 1>, scalar_prefetch = 0 : i64, scratch_operands = 0 : i64, tpu.core_type = #tpu.core_type<tc>, window_params = [{transform_indices = @transform_0, window_bounds = array<i64: 1, 34, 128>}, {transform_indices = @transform_1, window_bounds = array<i64: 3, 128, 128>}, {transform_indices = @transform_2, window_bounds = array<i64: 1, 128>}, {transform_indices = @transform_3, window_bounds = array<i64: 1, 32, 128>}]} {
    %cst = arith.constant 0.000000e+00 : f32
    %0 = vector.broadcast %cst : f32 to vector<32x128xf32>
    %c0 = arith.constant 0 : index
    %c0_0 = arith.constant 0 : index
    %c0_1 = arith.constant 0 : index
    %1 = vector.load %arg2[%c0, %c0_0, %c0_1] : memref<1x34x128xf32, #tpu.memory_space<vmem>>, vector<1x32x128xf32>
    %2 = vector.shape_cast %1 : vector<1x32x128xf32> to vector<32x128xf32>
    %3 = arith.truncf %2 : vector<32x128xf32> to vector<32x128xbf16>
    %c0_2 = arith.constant 0 : index
    %c0_3 = arith.constant 0 : index
    %c0_4 = arith.constant 0 : index
    %4 = vector.load %arg3[%c0_2, %c0_3, %c0_4] : memref<3x128x128xbf16, #tpu.memory_space<vmem>>, vector<1x128x128xbf16>
    %5 = vector.shape_cast %4 : vector<1x128x128xbf16> to vector<128x128xbf16>
    %cst_5 = arith.constant dense<0.000000e+00> : vector<32x128xf32>
    %6 = tpu.matmul %3, %5, %cst_5 {dimension_numbers = #tpu.dot_dimension_numbers<[1], [0], [0], [1], [0, 0, 1, 1], [], []>} : vector<32x128xbf16>, vector<128x128xbf16>, vector<32x128xf32> -> vector<32x128xf32>
    %7 = arith.addf %0, %6 : vector<32x128xf32>
    %c0_6 = arith.constant 0 : index
    %c1 = arith.constant 1 : index
    %c0_7 = arith.constant 0 : index
    %8 = vector.load %arg2[%c0_6, %c1, %c0_7] : memref<1x34x128xf32, #tpu.memory_space<vmem>>, vector<1x32x128xf32>
    %9 = vector.shape_cast %8 : vector<1x32x128xf32> to vector<32x128xf32>
    %10 = arith.truncf %9 : vector<32x128xf32> to vector<32x128xbf16>
    %c1_8 = arith.constant 1 : index
    %c0_9 = arith.constant 0 : index
    %c0_10 = arith.constant 0 : index
    %11 = vector.load %arg3[%c1_8, %c0_9, %c0_10] : memref<3x128x128xbf16, #tpu.memory_space<vmem>>, vector<1x128x128xbf16>
    %12 = vector.shape_cast %11 : vector<1x128x128xbf16> to vector<128x128xbf16>
    %cst_11 = arith.constant dense<0.000000e+00> : vector<32x128xf32>
    %13 = tpu.matmul %10, %12, %cst_11 {dimension_numbers = #tpu.dot_dimension_numbers<[1], [0], [0], [1], [0, 0, 1, 1], [], []>} : vector<32x128xbf16>, vector<128x128xbf16>, vector<32x128xf32> -> vector<32x128xf32>
    %14 = arith.addf %7, %13 : vector<32x128xf32>
    %c0_12 = arith.constant 0 : index
    %c2 = arith.constant 2 : index
    %c0_13 = arith.constant 0 : index
    %15 = vector.load %arg2[%c0_12, %c2, %c0_13] : memref<1x34x128xf32, #tpu.memory_space<vmem>>, vector<1x32x128xf32>
    %16 = vector.shape_cast %15 : vector<1x32x128xf32> to vector<32x128xf32>
    %17 = arith.truncf %16 : vector<32x128xf32> to vector<32x128xbf16>
    %c2_14 = arith.constant 2 : index
    %c0_15 = arith.constant 0 : index
    %c0_16 = arith.constant 0 : index
    %18 = vector.load %arg3[%c2_14, %c0_15, %c0_16] : memref<3x128x128xbf16, #tpu.memory_space<vmem>>, vector<1x128x128xbf16>
    %19 = vector.shape_cast %18 : vector<1x128x128xbf16> to vector<128x128xbf16>
    %cst_17 = arith.constant dense<0.000000e+00> : vector<32x128xf32>
    %20 = tpu.matmul %17, %19, %cst_17 {dimension_numbers = #tpu.dot_dimension_numbers<[1], [0], [0], [1], [0, 0, 1, 1], [], []>} : vector<32x128xbf16>, vector<128x128xbf16>, vector<32x128xf32> -> vector<32x128xf32>
    %21 = arith.addf %14, %20 : vector<32x128xf32>
    %c0_18 = arith.constant 0 : index
    %c0_19 = arith.constant 0 : index
    %22 = vector.load %arg4[%c0_18, %c0_19] : memref<1x128xf32, #tpu.memory_space<vmem>>, vector<1x128xf32>
    %23 = vector.broadcast %22 : vector<1x128xf32> to vector<32x128xf32>
    %24 = arith.addf %21, %23 : vector<32x128xf32>
    %cst_20 = arith.constant 5.000000e-01 : f32
    %25 = vector.broadcast %cst_20 : f32 to vector<32x128xf32>
    %26 = arith.mulf %25, %24 : vector<32x128xf32>
    %cst_21 = arith.constant 4.471500e-02 : f32
    %27 = vector.broadcast %cst_21 : f32 to vector<32x128xf32>
    %28 = arith.mulf %27, %24 : vector<32x128xf32>
    %29 = arith.mulf %28, %24 : vector<32x128xf32>
    %30 = arith.mulf %29, %24 : vector<32x128xf32>
    %31 = arith.addf %24, %30 : vector<32x128xf32>
    %cst_22 = arith.constant 0.797884583 : f32
    %32 = vector.broadcast %cst_22 : f32 to vector<32x128xf32>
    %33 = arith.mulf %32, %31 : vector<32x128xf32>
    %34 = math.tanh %33 : vector<32x128xf32>
    %cst_23 = arith.constant 1.000000e+00 : f32
    %35 = vector.broadcast %cst_23 : f32 to vector<32x128xf32>
    %36 = arith.addf %35, %34 : vector<32x128xf32>
    %37 = arith.mulf %26, %36 : vector<32x128xf32>
    %38 = arith.truncf %37 : vector<32x128xf32> to vector<32x128xbf16>
    %c0_24 = arith.constant 0 : index
    %c0_25 = arith.constant 0 : index
    %c0_26 = arith.constant 0 : index
    %39 = vector.load %arg5[%c0_24, %c0_25, %c0_26] : memref<1x32x128xbf16, #tpu.memory_space<vmem>>, vector<1x32x128xbf16>
    %40 = vector.shape_cast %39 : vector<1x32x128xbf16> to vector<32x128xbf16>
    %41 = vector.shape_cast %38 : vector<32x128xbf16> to vector<1x32x128xbf16>
    tpu.vector_store %arg5[%c0_24, %c0_25, %c0_26], %41 {strides = array<i32>} : memref<1x32x128xbf16, #tpu.memory_space<vmem>>, vector<1x32x128xbf16>,
    return
  }
  func.func @transform_0(%arg0: i32, %arg1: i32) -> (i32, i32, i32) {
    %c0_i32 = arith.constant 0 : i32
    %c0_i32_0 = arith.constant 0 : i32
    %c0_i32_1 = arith.constant 0 : i32
    return %arg0, %c0_i32, %c0_i32_0 : i32, i32, i32
  }
  func.func @transform_1(%arg0: i32, %arg1: i32) -> (i32, i32, i32) {
    %c0_i32 = arith.constant 0 : i32
    %c0_i32_0 = arith.constant 0 : i32
    %c0_i32_1 = arith.constant 0 : i32
    return %c0_i32, %c0_i32_0, %arg1 : i32, i32, i32
  }
  func.func @transform_2(%arg0: i32, %arg1: i32) -> (i32, i32) {
    %c0_i32 = arith.constant 0 : i32
    %c0_i32_0 = arith.constant 0 : i32
    return %c0_i32, %arg1 : i32, i32
  }
  func.func @transform_3(%arg0: i32, %arg1: i32) -> (i32, i32, i32) {
    %c0_i32 = arith.constant 0 : i32
    %c0_i32_0 = arith.constant 0 : i32
    return %arg0, %c0_i32, %arg1 : i32, i32, i32
  }
}

</mosaic_0001>

<bundles_post_ra>
// kernel: tpu_custom_call.1
= control target key start
LH: loop header
LB: loop body
LE: loop exit
PB: predicated region body
PF: predicated region fallthrough
CT: control target
= control target key end

     0   :  { %8 = vsyncpa [#allocation3], 0  ;;  %s1332_s0 = inlined_call_operand.vmem [shape: f32[2,34,128], index: 0, kind: input, shape index: {}]   ;;  %s1333_s1 = inlined_call_operand.hbm [shape: bf16[3,128,128], index: 1, kind: input, shape index: {}]   ;;  %s1334_s2 = inlined_call_operand.vmem [shape: f32[1,128], index: 2, kind: input, shape index: {}]   ;;  %s1335_s3 = inlined_call_operand.hbm [shape: bf16[2,32,128], index: 3, kind: output, shape index: {}]  }
   0x1   :  { %9 = vsyncpa [#allocation4], 0 }
   0x2   :  { %11 = vsyncpa [#allocation4 + $0x1], 0  ;;  %s1162_s12 = smov 0   ;;  %s1164_s13 = smov 0  }
   0x3   :  { %s1166_s14 = smov 0   ;;  %s1168_s15 = smov 0  }
   0x4   :  { %s1170_s16 = smov 0   ;;  %s1172_s17 = smov 0  }
   0x5 LB: > { %s763_s18 = sadd.s32 4294967295, %s1134_s17   ;;  %s764_s19 = sadd.s32 4294967294, %s1134_s17   ;;  %s1134_s17 = sphi %s1172_s17, %s17_s17   ;;  %s1130_s16 = sphi %s1170_s16, %s1353_s16   ;;  %s1126_s15 = sphi %s1168_s15, %s1352_s15   ;;  %s1122_s14 = sphi %s1166_s14, %s1351_s14   ;;  %s1118_s13 = sphi %s1164_s13, %s1350_s13   ;;  %s1114_s12 = sphi %s1162_s12, %s1349_s12  }
   0x6   : > { %s29_s20 = sadd.s32 1, %s1130_s16  ;;  %s116_s21 = sadd.s32 1, %s1122_s14 }
   0x7   : > { %p31_p0 = scmp.ge.s32.totalorder %s29_s20, 2  ;;  %p126_p1 = scmp.ne.s32.totalorder %s1122_s14, %s1118_s13 }
   0x8   : > { %p127_p2 = scmp.eq.s32.totalorder %s763_s18, 1  ;;  %p132_p3 = scmp.ne.s32.totalorder %s1118_s13, %s1114_s12 }
   0x9   : > { %s1355_s20 = smov (%p31_p0, %s29_s20), 0  ;;  %p133_p5 = scmp.eq.s32.totalorder %s764_s19, 1 }
   0xa   : > { %p1202_p4 = por %p127_p2, %p126_p1  ;;  %s111_s23 = ssub.s32 %s1130_s16, %s1355_s20 }
   0xb   : > { %p765_p6 = scmp.ge.s32.totalorder %s1134_s17, 1  ;;  %p114_p7 = scmp.eq.s32.totalorder %s111_s23, 0 }
   0xc   : > { %s1340_s22 = scalar_select %p1202_p4, 1, 0 }
   0xd   : > { %p1209_p8 = por %p133_p5, %p132_p3  ;;  %p140_p9 = scmp.lt.s32.totalorder %s1134_s17, 3 }
   0xe   : > { %s1215_s25 = scalar_select %p114_p7, %s1122_s14, %s116_s21  }
   0xf   : > { %s1341_s24 = scalar_select %p1209_p8, 1, 0 }
  0x10   : > { %p1217_p10 = pnand %p765_p6, %p140_p9  ;;  %p1221_p11 = scmp.eq.s32.totalorder %s763_s18, 0 }
  0x11   : > { %s1136_s28 = smov [#allocation2]   ;;  %s1024_s6 = scalar_lea.hbm %s1333_s1, 3072 }
  0x12   : > { %s1342_s26 = scalar_select %p1217_p10, 1, 0 }
  0x13   : > { %s1343_s27 = scalar_select %p1221_p11, 1, 0 }
  0x14   : > { %p928_p12 = pneg %p1217_p10  ;;  %s154_s29 = sshll.u32 %s1136_s28, 4  ;;  %s155_s29 = int_to_ptr.vmem [resolvable:$true] %s154_s29 }
  0x15   : > { %p1025_p0 = scmp.ne.s32.totalorder %s1333_s1, %s1024_s6  ;;  %p1031_p5 = scmp.lt.u32.totalorder %s1024_s6, %s1333_s1 }
  0x16   : > { %p1229_p13 = pnand %p1221_p11, %p928_p12 }
  0x18   : > { %p1026_p1 = pneg %p1229_p13 }
  0x1a   : > { %p1027_p2 = pnand %p1026_p1, %p1025_p0 }
  0x1c   : > { %p1028_p3 = pneg %p1027_p2 }
  0x1e   : > { %p1033_p6 = pnand %p1031_p5, %p1028_p3 }
  0x20   : > { %1036 = shalt.err (!%p1033_p6)
}
  0x21   : > { %s1037_s11 = scalar_lea.vmem %s155_s29, 3072  ;;  %p1045_p8 = scmp.lt.s32.totalorder %s155_s29, %s155_s29 }
  0x22   : > { %p1038_p7 = scmp.ne.s32.totalorder %s155_s29, %s1037_s11  ;;  %p1046_p4 = scmp.lt.s32.totalorder %s1037_s11, %s1037_s11 }
  0x24   : > { %p1040_p9 = pnand %p1038_p7, %p1026_p1  ;;  %p1047_p11 = por %p1046_p4, %p1045_p8 }
  0x26   : > { %p1041_p12 = pneg %p1040_p9 }
  0x28   : > { %p1048_p10 = pnand %p1047_p11, %p1041_p12 }
  0x2a   : > { %1051 = shalt.err (!%p1048_p10)
}
  0x2b   : > { %s1137_s18 = smov 64   ;;  %s1138_s19 = smov 4  }
  0x2c   : > { %931 = dma.hbm_to_vmem [thread:$0]  (!%p1229_p13), %s1333_s1, 3072, %s155_s29, [#allocation3], %s1137_s18, %s1137_s18, %s1138_s19  }
  0x2d   : > { %p1345_p0 = scmp.ne.s32.totalorder %s1342_s26, 0 }
  0x2e   : > { %p1346_p2 = scmp.ne.s32.totalorder (!%p1345_p0), %s1343_s27, 0 }
  0x2f   : > { %184 = sbr.rel (%p1345_p0) target bundleno = 381 (0x17d), region = 32 }
  0x36   : > { %1105 = dma.done.wait (%p1346_p2), [#allocation3], 3072  }
  0x37   : > { %1107 = vsyncadd (%p1346_p2), [#allocation3], 4294964224  ;;  %p211_p4 = scmp.lt.s32.totalorder %s1126_s15, 1  ;;  %v992_v0 = vld [vmem:[#allocation2] sm:$0xff]   ;;  %v993_v1 = vld [vmem:[#allocation2 + $0x8] sm:$0xff]   ;;  %s208_s6 = sand.u32 1, %s1118_s13  }
  0x38   : > { %873 = vmatprep.subr.bf16.mxu0 %v992_v0  ;;  %v994_v2 = vld [vmem:[#allocation2 + $0x10] sm:$0xff]   ;;  %v995_v3 = vld [vmem:[#allocation2 + $0x18] sm:$0xff]   ;;  %v1000_v4 = vld [vmem:[#allocation2 + $0x40] sm:$0xff]   ;;  %s771_s7 = sshll.u32 %s208_s6, 4  ;;  %s811_s8 = sshll.u32 %s1126_s15, 8 }
  0x39   : > { %s212_s28 = scalar_select %p211_p4, %s1126_s15, 1  ;;  %874 = vmatpush3.bf16.msra.mxu0 %v992_v0  ;;  %853 = vmatprep.subr.bf16.mxu1 %v1000_v4  ;;  %v1002_v8 = vld [vmem:[#allocation2 + $0x48] sm:$0xff]   ;;  %v996_v9 = vld [vmem:[#allocation2 + $0x20] sm:$0xff]   ;;  %v1004_v10 = vld [vmem:[#allocation2 + $0x50] sm:$0xff]  }
  0x3a   : > { %875 = vmatprep.subr.bf16.mxu0 %v993_v1  ;;  %854 = vmatpush3.bf16.msra.mxu1 %v1000_v4  ;;  %v997_v11 = vld [vmem:[#allocation2 + $0x28] sm:$0xff]   ;;  %v1006_v12 = vld [vmem:[#allocation2 + $0x58] sm:$0xff]   ;;  %v998_v13 = vld [vmem:[#allocation2 + $0x30] sm:$0xff]   ;;  %s210_s9 = scalar_lea.vmem [#allocation5], %s771_s7  ;;  %s1282_s19 = scalar_lea.hbm %s1335_s3, %s811_s8 }
  0x3b   : > { %s921_s30 = smul.u32 40, %s212_s28  ;;  %855 = vmatprep.subr.bf16.mxu1 %v1002_v8  ;;  %v1008_v14 = vld [vmem:[#allocation2 + $0x60] sm:$0xff]   ;;  %v999_v15 = vld [vmem:[#allocation2 + $0x38] sm:$0xff]   ;;  %v1010_v16 = vld [vmem:[#allocation2 + $0x68] sm:$0xff]   ;;  %s665_s10 = sshll.u32 %s210_s9, 4  ;;  %s1284_s10 = int_to_ptr.vmem [resolvable:$true] %s665_s10 }
  0x3c   : > { %v1001_v22 = vld [vmem:[#allocation2 + $0x80] sm:$0xff]   ;;  %v1012_v23 = vld [vmem:[#allocation2 + $0x70] sm:$0xff]   ;;  %v1003_v27 = vld [vmem:[#allocation2 + $0x88] sm:$0xff]   ;;  %s1286_s15 = scalar_lea.sflag [#allocation4], %s208_s6  ;;  %s1052_s21 = scalar_lea.vmem %s1284_s10, 256 }
  0x3d   : > { %s1260_s4 = scalar_lea.vmem %s1332_s0, %s921_s30  ;;  %876 = vmatpush3.bf16.msra.mxu0 %v993_v1  ;;  %v1014_v28 = vld [vmem:[#allocation2 + $0x78] sm:$0xff]   ;;  %v1005_v32 = vld [vmem:[#allocation2 + $0x90] sm:$0xff]   ;;  %v1009_v35 = vld [vmem:[#allocation2 + $0xa0] sm:$0xff]   ;;  %p1053_p8 = scmp.ne.s32.totalorder %s1284_s10, %s1052_s21 }
  0x3e   : > { %877 = vmatprep.subr.bf16.mxu0 %v994_v2  ;;  %v220_v5 = vld [vmem:[%s1260_s4] sm:$0xff]  ;;  %v221_v6 = vld [vmem:[%s1260_s4 + $0x8] sm:$0xff]  ;;  %856 = vmatpush3.bf16.msra.mxu1 %v1002_v8  ;;  %v222_v20 = vld [vmem:[%s1260_s4 + $0x10] sm:$0xff]  ;;  %p1347_p10 = scmp.ne.s32.totalorder %s1340_s22, 0  ;;  %s1139_s23 = smov [#allocation5]  }
  0x3f   : > { %v224_v7 = vpack.c.bf16 %v221_v6, %v220_v5  ;;  %857 = vmatprep.subr.bf16.mxu1 %v1004_v10  ;;  %v242_v17 = vld [vmem:[%s1260_s4 + $0x1] sm:$0xff]  ;;  %v243_v18 = vld [vmem:[%s1260_s4 + $0x9] sm:$0xff]  ;;  %v223_v21 = vld [vmem:[%s1260_s4 + $0x18] sm:$0xff]  ;;  %s1056_s28 = sshll.u32 %s1139_s23, 4  ;;  %s1057_s28 = int_to_ptr.vmem [resolvable:$false] %s1056_s28 }
  0x40   : > { %v246_v19 = vpack.c.bf16 %v243_v18, %v242_v17  ;;  %v225_v24 = vpack.c.bf16 %v223_v21, %v222_v20  ;;  %v459_v25 = vld [vmem:[%s1260_s4 + $0x2] sm:$0xff]  ;;  %v460_v26 = vld [vmem:[%s1260_s4 + $0xa] sm:$0xff]  ;;  %v245_v31 = vld [vmem:[%s1260_s4 + $0x19] sm:$0xff]  ;;  %p1054_p11 = pnand %p1053_p8, %p1347_p10  ;;  %s1058_s30 = scalar_lea.vmem %s1057_s28, 512 }
  0x41   : > { %878 = vmatpush3.bf16.msra.mxu0 %v994_v2  ;;  %889 = vmatprep.mubr.bf16.mxu0 %v224_v7  ;;  %v463_v29 = vpack.c.bf16 %v460_v26, %v459_v25  ;;  %v244_v30 = vld [vmem:[%s1260_s4 + $0x11] sm:$0xff]  ;;  %v1007_v34 = vld [vmem:[#allocation2 + $0x98] sm:$0xff]   ;;  %v1013_v37 = vld [vmem:[#allocation2 + $0xb0] sm:$0xff]   ;;  %p1059_p1 = scmp.lt.s32.totalorder %s1284_s10, %s1057_s28  ;;  %p1060_p3 = scmp.lt.s32.totalorder %s1058_s30, %s1052_s21 }
  0x42   : > { %879 = vmatprep.subr.bf16.mxu0 %v995_v3  ;;  %858 = vmatpush3.bf16.msra.mxu1 %v1004_v10  ;;  %v247_v33 = vpack.c.bf16 %v245_v31, %v244_v30  ;;  %v1011_v36 = vld [vmem:[#allocation2 + $0xa8] sm:$0xff]   ;;  %v1015_v38 = vld [vmem:[#allocation2 + $0xb8] sm:$0xff]   ;;  %v797_v47 = vld [vmem:[%s1334_s2] ss:$0 sm:$0xff]  ;;  %p1055_p13 = pneg %p1054_p11 }
  0x43   : > { %859 = vmatprep.subr.bf16.mxu1 %v1006_v12  ;;  %869 = vmatprep.mubr.bf16.mxu1 %v246_v19  ;;  %v461_v39 = vld [vmem:[%s1260_s4 + $0x12] sm:$0xff]  ;;  %v462_v40 = vld [vmem:[%s1260_s4 + $0x1a] sm:$0xff]  ;;  %p1061_p5 = por %p1060_p3, %p1059_p1 }
  0x44   : > { %v464_v41 = vpack.c.bf16 %v462_v40, %v461_v39 }
  0x45   : > { %880 = vmatpush3.bf16.msra.mxu0 %v995_v3  ;;  %p1062_p6 = pnand %p1061_p5, %p1055_p13 }
  0x46   : > { %881 = vmatprep.subr.bf16.mxu0 %v996_v9  ;;  %860 = vmatpush3.bf16.msra.mxu1 %v1006_v12 }
  0x47   : > { %861 = vmatprep.subr.bf16.mxu1 %v1008_v14 }
  0x49   : > { %882 = vmatpush3.bf16.msra.mxu0 %v996_v9 }
  0x4a   : > { %883 = vmatprep.subr.bf16.mxu0 %v997_v11  ;;  %862 = vmatpush3.bf16.msra.mxu1 %v1008_v14 }
  0x4b   : > { %863 = vmatprep.subr.bf16.mxu1 %v1010_v16 }
  0x4d   : > { %884 = vmatpush3.bf16.msra.mxu0 %v997_v11 }
  0x4e   : > { %885 = vmatprep.subr.bf16.mxu0 %v998_v13  ;;  %864 = vmatpush3.bf16.msra.mxu1 %v1010_v16 }
  0x4f   : > { %865 = vmatprep.subr.bf16.mxu1 %v1012_v23 }
  0x51   : > { %886 = vmatpush3.bf16.msra.mxu0 %v998_v13 }
  0x52   : > { %887 = vmatprep.subr.bf16.mxu0 %v999_v15  ;;  %866 = vmatpush3.bf16.msra.mxu1 %v1012_v23 }
  0x53   : > { %867 = vmatprep.subr.bf16.mxu1 %v1014_v28 }
  0x55   : > { %888 = vmatpush3.bf16.msra.mxu0 %v999_v15 }
  0x56   : > { %893 = vmatprep.subr.bf16.mxu0 %v1001_v22  ;;  %868 = vmatpush3.bf16.msra.mxu1 %v1014_v28 }
  0x58   : > { %890 = vmatmul.mubr.bf16.vlgmr.msra.gmra.mrb[0].mxu0 %v225_v24 }
  0x59   : > { %894 = vmatpush3.bf16.msra.mxu0 %v1001_v22  ;;  %909 = vmatprep.mubr.bf16.mxu0 %v463_v29 }
  0x5a   : > { %895 = vmatprep.subr.bf16.mxu0 %v1003_v27  ;;  %870 = vmatmul.mubr.bf16.vlgmr.msra.gmra.mrb[0].mxu1 %v247_v33 }
  0x5d   : > { %896 = vmatpush3.bf16.msra.mxu0 %v1003_v27 }
  0x5e   : > { %897 = vmatprep.subr.bf16.mxu0 %v1005_v32 }
  0x61   : > { %898 = vmatpush3.bf16.msra.mxu0 %v1005_v32 }
  0x62   : > { %899 = vmatprep.subr.bf16.mxu0 %v1007_v34 }
  0x65   : > { %900 = vmatpush3.bf16.msra.mxu0 %v1007_v34 }
  0x66   : > { %901 = vmatprep.subr.bf16.mxu0 %v1009_v35 }
  0x69   : > { %902 = vmatpush3.bf16.msra.mxu0 %v1009_v35 }
  0x6a   : > { %903 = vmatprep.subr.bf16.mxu0 %v1011_v36 }
  0x6d   : > { %904 = vmatpush3.bf16.msra.mxu0 %v1011_v36 }
  0x6e   : > { %905 = vmatprep.subr.bf16.mxu0 %v1013_v37 }
  0x71   : > { %906 = vmatpush3.bf16.msra.mxu0 %v1013_v37 }
  0x72   : > { %907 = vmatprep.subr.bf16.mxu0 %v1015_v38 }
  0x75   : > { %908 = vmatpush3.bf16.msra.mxu0 %v1015_v38 }
  0x78   : > { %910 = vmatmul.mubr.bf16.vlgmr.msra.gmra.mrb[0].mxu0 %v464_v41 }
 0x12d   : > { %v871_v42 = vpop.f32.mrb[0].mxu1 }
 0x12e   : > { %v347_v43 = vpop.f32.mrb[1].mxu1 }
 0x12f   : > { %v872_v44 = vpop.f32.mrb[2].mxu1 }
 0x130   : > { %v350_v45 = vpop.f32.mrb[3].mxu1 }
 0x14b   : > { %v911_v46 = vpop.f32.mrb[0].mxu0 }
 0x14c   : > { %v913_v48 = vadd.f32 %v911_v46, %v871_v42  ;;  %v564_v49 = vpop.f32.mrb[1].mxu0 }
 0x14d   : > { %v914_v50 = vadd.f32 %v564_v49, %v347_v43  ;;  %v912_v51 = vpop.f32.mrb[2].mxu0 }
 0x14e   : > { %v592_v52 = vadd.f32 %v913_v48, %v797_v47  ;;  %v915_v53 = vadd.f32 %v912_v51, %v872_v44  ;;  %v567_v54 = vpop.f32.mrb[3].mxu0 }
 0x14f   : > { %v590_v55 = vadd.f32 %v914_v50, %v797_v47  ;;  %v916_v56 = vadd.f32 %v567_v54, %v350_v45 }
 0x150   : > { %v600_v57 = vmul.f32 0.044715, %v592_v52  ;;  %v593_v58 = vadd.f32 %v915_v53, %v797_v47  ;;  %v596_v21 = vmul.f32 0.5, %v592_v52 }
 0x151   : > { %v598_v59 = vmul.f32 0.044715, %v590_v55  ;;  %v591_v60 = vadd.f32 %v916_v56, %v797_v47  ;;  %v594_v24 = vmul.f32 0.5, %v590_v55 }
 0x152   : > { %v604_v61 = vmul.f32 %v600_v57, %v592_v52  ;;  %v601_v62 = vmul.f32 0.044715, %v593_v58  ;;  %v597_v22 = vmul.f32 0.5, %v593_v58 }
 0x153   : > { %v602_v63 = vmul.f32 %v598_v59, %v590_v55  ;;  %v599_v0 = vmul.f32 0.044715, %v591_v60  ;;  %v595_v25 = vmul.f32 0.5, %v591_v60 }
 0x154   : > { %v608_v1 = vmul.f32 %v604_v61, %v592_v52  ;;  %v605_v2 = vmul.f32 %v601_v62, %v593_v58 }
 0x155   : > { %v606_v3 = vmul.f32 %v602_v63, %v590_v55  ;;  %v603_v4 = vmul.f32 %v599_v0, %v591_v60 }
 0x156   : > { %v612_v5 = vadd.f32 %v608_v1, %v592_v52  ;;  %v609_v6 = vmul.f32 %v605_v2, %v593_v58 }
 0x157   : > { %v610_v7 = vadd.f32 %v606_v3, %v590_v55  ;;  %v607_v8 = vmul.f32 %v603_v4, %v591_v60 }
 0x158   : > { %v616_v9 = vmul.f32 0.7978846, %v612_v5  ;;  %v613_v10 = vadd.f32 %v609_v6, %v593_v58 }
 0x159   : > { %v614_v11 = vmul.f32 0.7978846, %v610_v7  ;;  %v611_v12 = vadd.f32 %v607_v8, %v591_v60 }
 0x15a   : > { %1016 = vtanh.f32 %v616_v9  ;;  %v617_v13 = vmul.f32 0.7978846, %v613_v10 }
 0x15b   : > { %1018 = vtanh.f32 %v614_v11  ;;  %v615_v14 = vmul.f32 0.7978846, %v611_v12 }
 0x15c   : > { %1020 = vtanh.f32 %v617_v13 }
 0x15d   : > { %1022 = vtanh.f32 %v615_v14 }
 0x164   : > { %v1017_v15 = vpop.eup %1016 }
 0x165   : > { %v1019_v16 = vpop.eup %1018  ;;  %v624_v17 = vadd.f32 1.0, %v1017_v15 }
 0x166   : > { %v1021_v18 = vpop.eup %1020  ;;  %v622_v19 = vadd.f32 1.0, %v1019_v16 }
 0x167   : > { %v1023_v20 = vpop.eup %1022  ;;  %v625_v23 = vadd.f32 1.0, %v1021_v18  ;;  %v628_v27 = vmul.f32 %v624_v17, %v596_v21 }
 0x168   : > { %v623_v26 = vadd.f32 1.0, %v1023_v20  ;;  %v626_v29 = vmul.f32 %v622_v19, %v594_v24 }
 0x169   : > { %v629_v28 = vmul.f32 %v625_v23, %v597_v22 }
 0x16a   : > { %v627_v30 = vmul.f32 %v623_v26, %v595_v25 }
 0x16b   : > { %v820_v31 = vpack.c.bf16 %v629_v28, %v628_v27 }
 0x16c   : > { %v815_v32 = vpack.c.bf16 %v627_v30, %v626_v29 }
 0x16d   : > { %822 = vst [vmem:[%s210_s9 + $0x8] sm:$0xff] %v820_v31  }
 0x16e   : > { %816 = vst [vmem:[%s210_s9] sm:$0xff] %v815_v32  }
 0x16f   : > { %1065 = shalt.err (!%p1062_p6)
}
 0x170   : > { %s1066_s29 = scalar_lea.hbm %s1282_s19, 256  ;;  %s1070_s27 = scalar_lea.hbm %s1335_s3, 512 }
 0x171   : > { %p1067_p7 = scmp.ne.s32.totalorder %s1282_s19, %s1066_s29  ;;  %p1071_p0 = scmp.lt.u32.totalorder %s1282_s19, %s1335_s3 }
 0x172   : > { %p1072_p2 = scmp.lt.u32.totalorder %s1070_s27, %s1066_s29  ;;  %p1074_p8 = scmp.lt.u32.totalorder %s1066_s29, %s1282_s19 }
 0x173   : > { %p1068_p9 = pnand %p1067_p7, %p1347_p10 }
 0x174   : > { %p1073_p4 = por %p1072_p2, %p1071_p0 }
 0x175   : > { %p1069_p12 = pneg %p1068_p9 }
 0x176   : > { %p1075_p11 = por %p1074_p8, %p1073_p4 }
 0x178   : > { %p1076_p13 = pnand %p1075_p11, %p1069_p12 }
 0x17a   : > { %1079 = shalt.err (!%p1076_p13)
}
 0x17b   : > { %s1140_s7 = smov 64   ;;  %s1141_s8 = smov 4  }
 0x17c   : > { %926 = dma.vmem_to_hbm [thread:$0]  (%p1347_p10), %s1284_s10, 256, %s1282_s19, %s1286_s15, %s1140_s7, %s1140_s7, %s1141_s8  }
 0x17d PF: > { %p938_p1 = scmp.ge.s32.totalorder %s1134_s17, 2  ;;  %s680_s9 = sand.u32 1, %s1114_s12  }
 0x17e   : > { %p1348_p3 = scmp.ne.s32.totalorder %s1341_s24, 0  ;;  %s681_s11 = scalar_lea.sflag [#allocation4], %s680_s9 }
 0x180   : > { %p933_p5 = pnand %p938_p1, %p1348_p3 }
 0x182   : > { %1109 = dma.done.wait (!%p933_p5), %s681_s11, 256  }
 0x183   : > { %1111 = vsyncadd (!%p933_p5), %s681_s11, 4294967040  ;;  %s17_s17 = sadd.s32 1, %s1134_s17   ;;  %s1349_s12 = smov %s1118_s13 }
 0x184   : > { %p14_p6 = scmp.ge.s32.totalorder %s17_s17, 4   ;;  %s1350_s13 = smov %s1122_s14 }
 0x185   : > { %s1351_s14 = smov %s1215_s25  ;;  %s1352_s15 = smov %s1130_s16 }
 0x186   : > { %s1353_s16 = smov %s1355_s20  ;;  %16 = sbr.rel (!%p14_p6) target bundleno = 5 (0x5), region = 78 }
 0x18d   :  { %686 = vsyncpa [#allocation3], 1 }
 0x18e   :  { %688 = vsyncpa [#allocation3 + $0x1], 1 }
 0x18f   :  { %689 = vsyncpa [#allocation4], 1 }
 0x190   :  { %691 = vsyncpa [#allocation4 + $0x1], 1 }

</bundles_post_ra>
